<compile_context>
chip_gen: v7x
topology: tpu7x:2x2x1
jax: 0.10.0
libtpu: 0.0.40
codegen_flags: <defaults>
</compile_context>

<pallas_src>
import jax
import jax.numpy as jnp
from jax.experimental import pallas as pl
from jax.experimental.pallas import tpu as pltpu


def downblock_kernel(x_ref, w_ref, b_ref, o_ref):
    # x_ref: (1, 2, C_in, Lp)  -- x_ref[0, p, i, j] = x[b, i, 2*j + p],  Lp = L // 2
    # w_ref: (3, C_out, C_in)  -- conv taps for input offsets -1, 0, +1 (pre-scaled by 1/2)
    # b_ref: (C_out, 1)        -- bias (pre-scaled by 1/2)
    # o_ref: (1, C_out, Lp)
    xe = x_ref[0, 0]                       # (C_in, Lp) values at even positions 2j
    xo = x_ref[0, 1]                       # (C_in, Lp) values at odd positions 2j+1
    c_in, lp = xe.shape
    c_out = b_ref.shape[0]

    zcol = jnp.zeros((c_in, 1), dtype=xe.dtype)
    # x at position 2j-1  (zero at j = 0     -> conv left pad)
    xo_m1 = jnp.concatenate([zcol, xo[:, : lp - 1]], axis=1)
    # x at position 2j+2  (zero at j = Lp-1  -> conv right pad)
    xe_p1 = jnp.concatenate([xe[:, 1:], zcol], axis=1)

    w0 = w_ref[0]                          # (C_out, C_in) tap multiplying x[l-1]
    w1 = w_ref[1]                          # tap multiplying x[l]
    w2 = w_ref[2]                          # tap multiplying x[l+1]

    # Hoisted bias broadcast, reused for both phases.
    bias_full = jnp.broadcast_to(b_ref[...], (c_out, lp))
    ce = bias_full                         # conv output at even positions 2j   (x 1/2)
    co = bias_full                         # conv output at odd positions 2j+1  (x 1/2)
    for i in range(c_in):                  # tiny channel count -> unrolled VPU FMAs
        ce = ce + w0[:, i:i + 1] * xo_m1[i:i + 1, :]
        ce = ce + w1[:, i:i + 1] * xe[i:i + 1, :]
        ce = ce + w2[:, i:i + 1] * xo[i:i + 1, :]
        co = co + w0[:, i:i + 1] * xe[i:i + 1, :]
        co = co + w1[:, i:i + 1] * xo[i:i + 1, :]
        co = co + w2[:, i:i + 1] * xe_p1[i:i + 1, :]

    # ReLU, then AvgPool1d(kernel=2, stride=2): the 1/2 scale is already folded into the
    # weights/bias (ReLU is positively homogeneous), so pooling is just a sum of phases.
    o_ref[0] = (jnp.maximum(ce, 0.0) + jnp.maximum(co, 0.0)).astype(o_ref.dtype)


def downblock_forward(x_ncl, w_oik, bias, *, interpret=False):
    """x_ncl: (B, C_in, L) f32; w_oik: (C_out, C_in, 3); bias: (C_out,).
    Returns (B, C_out, L//2) -- PyTorch NCL convention."""
    B, C_in, L = x_ncl.shape
    C_out, C_in2, K = w_oik.shape
    assert K == 3 and C_in2 == C_in and L % 2 == 0
    Lp = L // 2

    # De-interleave length into (even, odd) phases with Lp on the fast lane axis.
    # (single cheap XLA pass; replaces transpose + pad passes over the activations)
    x_pair = jnp.transpose(x_ncl.reshape(B, C_in, Lp, 2), (0, 3, 1, 2))  # (B, 2, C_in, Lp)
    # Fold the AvgPool(2) 1/2 scale into the conv weights and bias (valid because ReLU is
    # positively homogeneous: 0.5*relu(y) == relu(0.5*y)).
    w_koi = 0.5 * jnp.transpose(w_oik, (2, 0, 1))                        # (3, C_out, C_in)
    b_col = 0.5 * bias.reshape(C_out, 1)

    out = pl.pallas_call(
        downblock_kernel,
        out_shape=jax.ShapeDtypeStruct((B, C_out, Lp), jnp.float32),
        grid_spec=pltpu.PrefetchScalarGridSpec(
            num_scalar_prefetch=0,
            grid=(B,),
            in_specs=[
                pl.BlockSpec((1, 2, C_in, Lp), lambda b: (b, 0, 0, 0)),
                pl.BlockSpec((3, C_out, C_in), lambda b: (0, 0, 0)),
                pl.BlockSpec((C_out, 1), lambda b: (0, 0)),
            ],
            out_specs=pl.BlockSpec((1, C_out, Lp), lambda b: (b, 0, 0)),
        ),
        compiler_params=pltpu.CompilerParams(
            dimension_semantics=("parallel",)),
        interpret=interpret,
    )(x_pair, w_koi, b_col)

    return out  # already (B, C_out, L//2); no output transpose needed


def reference_forward(x_ncl, w_oik, bias):
    """Pure-JAX reference with PyTorch DownBlock semantics."""
    B, C_in, L = x_ncl.shape
    C_out = w_oik.shape[0]
    x_blc = jnp.transpose(x_ncl, (0, 2, 1))
    x_pad = jnp.pad(x_blc, ((0, 0), (1, 1), (0, 0)))
    w_kio = jnp.transpose(w_oik, (2, 1, 0))
    y = (jnp.einsum('bli,io->blo', x_pad[:, 0:L], w_kio[0]) +
         jnp.einsum('bli,io->blo', x_pad[:, 1:L + 1], w_kio[1]) +
         jnp.einsum('bli,io->blo', x_pad[:, 2:L + 2], w_kio[2]))
    y = jnp.maximum(y + bias[None, None, :], 0.0)
    y = y.reshape(B, L // 2, 2, C_out).mean(axis=2)
    return jnp.transpose(y, (0, 2, 1))


if __name__ == "__main__":
    key = jax.random.PRNGKey(0)
    B, C_in, C_out, L = 2, 4, 8, 16

    k_x, k_v, k_g, k_b = jax.random.split(key, 4)
    x = jax.random.normal(k_x, (B, C_in, L), dtype=jnp.float32)

    # weight_norm parameterization of the Conv1d weight (PyTorch layout (C_out, C_in, K),
    # dim=0): w = g * v / ||v||, norm over (C_in, K) per output channel.
    v = jax.random.normal(k_v, (C_out, C_in, 3), dtype=jnp.float32)
    g = jax.nn.softplus(jax.random.normal(k_g, (C_out,), dtype=jnp.float32)) + 0.5
    v_norm = jnp.sqrt(jnp.sum(v * v, axis=(1, 2), keepdims=True))
    w_oik = g[:, None, None] * v / v_norm                       # (C_out, C_in, 3)
    bias = 0.1 * jax.random.normal(k_b, (C_out,), dtype=jnp.float32)

    out = downblock_forward(x, w_oik, bias)
    out = jax.block_until_ready(out)

    ref = reference_forward(x, w_oik, bias)
    assert out.shape == (B, C_out, L // 2)
    assert jnp.allclose(out, ref, atol=1e-5, rtol=1e-5), "mismatch vs reference"

    print("KERNEL_OK")
</pallas_src>

<mosaic_0001>
module attributes {stable_mosaic.version = 11 : i64} {
  func.func @downblock_kernel(%arg0: i32, %arg1: memref<1x2x4x8xf32, #tpu.memory_space<vmem>>, %arg2: memref<3x8x4xf32, #tpu.memory_space<vmem>>, %arg3: memref<8x1xf32, #tpu.memory_space<vmem>>, %arg4: memref<1x8x8xf32, #tpu.memory_space<vmem>>) attributes {dimension_semantics = [#tpu.dimension_semantics<parallel>], iteration_bounds = array<i64: 2>, scalar_prefetch = 0 : i64, scratch_operands = 0 : i64, tpu.core_type = #tpu.core_type<tc>, window_params = [{transform_indices = @transform_0, window_bounds = array<i64: 1, 2, 4, 8>}, {pipeline_mode = #tpu.pipeline_mode<synchronous>, transform_indices = @transform_1, window_bounds = array<i64: 3, 8, 4>}, {pipeline_mode = #tpu.pipeline_mode<synchronous>, transform_indices = @transform_2, window_bounds = array<i64: 8, 1>}, {transform_indices = @transform_3, window_bounds = array<i64: 1, 8, 8>}]} {
    %c0 = arith.constant 0 : index
    %c0_0 = arith.constant 0 : index
    %c0_1 = arith.constant 0 : index
    %c0_2 = arith.constant 0 : index
    %0 = vector.load %arg1[%c0, %c0_0, %c0_1, %c0_2] : memref<1x2x4x8xf32, #tpu.memory_space<vmem>>, vector<1x1x4x8xf32>
    %1 = vector.shape_cast %0 : vector<1x1x4x8xf32> to vector<4x8xf32>
    %c0_3 = arith.constant 0 : index
    %c1 = arith.constant 1 : index
    %c0_4 = arith.constant 0 : index
    %c0_5 = arith.constant 0 : index
    %2 = vector.load %arg1[%c0_3, %c1, %c0_4, %c0_5] : memref<1x2x4x8xf32, #tpu.memory_space<vmem>>, vector<1x1x4x8xf32>
    %3 = vector.shape_cast %2 : vector<1x1x4x8xf32> to vector<4x8xf32>
    %cst = arith.constant 0.000000e+00 : f32
    %4 = vector.broadcast %cst : f32 to vector<4x1xf32>
    %5 = vector.extract_strided_slice %3 {offsets = [0, 0], sizes = [4, 7], strides = [1, 1]} : vector<4x8xf32> to vector<4x7xf32>
    %6 = tpu.concatenate %4, %5 in 1 : vector<4x1xf32>, vector<4x7xf32> -> vector<4x8xf32>
    %7 = vector.extract_strided_slice %1 {offsets = [0, 1], sizes = [4, 7], strides = [1, 1]} : vector<4x8xf32> to vector<4x7xf32>
    %8 = tpu.concatenate %7, %4 in 1 : vector<4x7xf32>, vector<4x1xf32> -> vector<4x8xf32>
    %c0_6 = arith.constant 0 : index
    %c0_7 = arith.constant 0 : index
    %c0_8 = arith.constant 0 : index
    %9 = vector.load %arg2[%c0_6, %c0_7, %c0_8] : memref<3x8x4xf32, #tpu.memory_space<vmem>>, vector<1x8x4xf32>
    %10 = vector.shape_cast %9 : vector<1x8x4xf32> to vector<8x4xf32>
    %c1_9 = arith.constant 1 : index
    %c0_10 = arith.constant 0 : index
    %c0_11 = arith.constant 0 : index
    %11 = vector.load %arg2[%c1_9, %c0_10, %c0_11] : memref<3x8x4xf32, #tpu.memory_space<vmem>>, vector<1x8x4xf32>
    %12 = vector.shape_cast %11 : vector<1x8x4xf32> to vector<8x4xf32>
    %c2 = arith.constant 2 : index
    %c0_12 = arith.constant 0 : index
    %c0_13 = arith.constant 0 : index
    %13 = vector.load %arg2[%c2, %c0_12, %c0_13] : memref<3x8x4xf32, #tpu.memory_space<vmem>>, vector<1x8x4xf32>
    %14 = vector.shape_cast %13 : vector<1x8x4xf32> to vector<8x4xf32>
    %c0_14 = arith.constant 0 : index
    %c0_15 = arith.constant 0 : index
    %15 = vector.load %arg3[%c0_14, %c0_15] : memref<8x1xf32, #tpu.memory_space<vmem>>, vector<8x1xf32>
    %16 = vector.shape_cast %15 : vector<8x1xf32> to vector<8x1xf32>
    %17 = vector.broadcast %16 : vector<8x1xf32> to vector<8x8xf32>
    %18 = vector.extract_strided_slice %10 {offsets = [0, 0], sizes = [8, 1], strides = [1, 1]} : vector<8x4xf32> to vector<8x1xf32>
    %19 = vector.extract_strided_slice %6 {offsets = [0, 0], sizes = [1, 8], strides = [1, 1]} : vector<4x8xf32> to vector<1x8xf32>
    %20 = vector.broadcast %18 : vector<8x1xf32> to vector<8x8xf32>
    %21 = vector.broadcast %19 : vector<1x8xf32> to vector<8x8xf32>
    %22 = arith.mulf %20, %21 : vector<8x8xf32>
    %23 = arith.addf %17, %22 : vector<8x8xf32>
    %24 = vector.extract_strided_slice %12 {offsets = [0, 0], sizes = [8, 1], strides = [1, 1]} : vector<8x4xf32> to vector<8x1xf32>
    %25 = vector.extract_strided_slice %1 {offsets = [0, 0], sizes = [1, 8], strides = [1, 1]} : vector<4x8xf32> to vector<1x8xf32>
    %26 = vector.broadcast %24 : vector<8x1xf32> to vector<8x8xf32>
    %27 = vector.broadcast %25 : vector<1x8xf32> to vector<8x8xf32>
    %28 = arith.mulf %26, %27 : vector<8x8xf32>
    %29 = arith.addf %23, %28 : vector<8x8xf32>
    %30 = vector.extract_strided_slice %14 {offsets = [0, 0], sizes = [8, 1], strides = [1, 1]} : vector<8x4xf32> to vector<8x1xf32>
    %31 = vector.extract_strided_slice %3 {offsets = [0, 0], sizes = [1, 8], strides = [1, 1]} : vector<4x8xf32> to vector<1x8xf32>
    %32 = vector.broadcast %30 : vector<8x1xf32> to vector<8x8xf32>
    %33 = vector.broadcast %31 : vector<1x8xf32> to vector<8x8xf32>
    %34 = arith.mulf %32, %33 : vector<8x8xf32>
    %35 = arith.addf %29, %34 : vector<8x8xf32>
    %36 = vector.extract_strided_slice %10 {offsets = [0, 0], sizes = [8, 1], strides = [1, 1]} : vector<8x4xf32> to vector<8x1xf32>
    %37 = vector.extract_strided_slice %1 {offsets = [0, 0], sizes = [1, 8], strides = [1, 1]} : vector<4x8xf32> to vector<1x8xf32>
    %38 = vector.broadcast %36 : vector<8x1xf32> to vector<8x8xf32>
    %39 = vector.broadcast %37 : vector<1x8xf32> to vector<8x8xf32>
    %40 = arith.mulf %38, %39 : vector<8x8xf32>
    %41 = arith.addf %17, %40 : vector<8x8xf32>
    %42 = vector.extract_strided_slice %12 {offsets = [0, 0], sizes = [8, 1], strides = [1, 1]} : vector<8x4xf32> to vector<8x1xf32>
    %43 = vector.extract_strided_slice %3 {offsets = [0, 0], sizes = [1, 8], strides = [1, 1]} : vector<4x8xf32> to vector<1x8xf32>
    %44 = vector.broadcast %42 : vector<8x1xf32> to vector<8x8xf32>
    %45 = vector.broadcast %43 : vector<1x8xf32> to vector<8x8xf32>
    %46 = arith.mulf %44, %45 : vector<8x8xf32>
    %47 = arith.addf %41, %46 : vector<8x8xf32>
    %48 = vector.extract_strided_slice %14 {offsets = [0, 0], sizes = [8, 1], strides = [1, 1]} : vector<8x4xf32> to vector<8x1xf32>
    %49 = vector.extract_strided_slice %8 {offsets = [0, 0], sizes = [1, 8], strides = [1, 1]} : vector<4x8xf32> to vector<1x8xf32>
    %50 = vector.broadcast %48 : vector<8x1xf32> to vector<8x8xf32>
    %51 = vector.broadcast %49 : vector<1x8xf32> to vector<8x8xf32>
    %52 = arith.mulf %50, %51 : vector<8x8xf32>
    %53 = arith.addf %47, %52 : vector<8x8xf32>
    %54 = vector.extract_strided_slice %10 {offsets = [0, 1], sizes = [8, 1], strides = [1, 1]} : vector<8x4xf32> to vector<8x1xf32>
    %55 = vector.extract_strided_slice %6 {offsets = [1, 0], sizes = [1, 8], strides = [1, 1]} : vector<4x8xf32> to vector<1x8xf32>
    %56 = vector.broadcast %54 : vector<8x1xf32> to vector<8x8xf32>
    %57 = vector.broadcast %55 : vector<1x8xf32> to vector<8x8xf32>
    %58 = arith.mulf %56, %57 : vector<8x8xf32>
    %59 = arith.addf %35, %58 : vector<8x8xf32>
    %60 = vector.extract_strided_slice %12 {offsets = [0, 1], sizes = [8, 1], strides = [1, 1]} : vector<8x4xf32> to vector<8x1xf32>
    %61 = vector.extract_strided_slice %1 {offsets = [1, 0], sizes = [1, 8], strides = [1, 1]} : vector<4x8xf32> to vector<1x8xf32>
    %62 = vector.broadcast %60 : vector<8x1xf32> to vector<8x8xf32>
    %63 = vector.broadcast %61 : vector<1x8xf32> to vector<8x8xf32>
    %64 = arith.mulf %62, %63 : vector<8x8xf32>
    %65 = arith.addf %59, %64 : vector<8x8xf32>
    %66 = vector.extract_strided_slice %14 {offsets = [0, 1], sizes = [8, 1], strides = [1, 1]} : vector<8x4xf32> to vector<8x1xf32>
    %67 = vector.extract_strided_slice %3 {offsets = [1, 0], sizes = [1, 8], strides = [1, 1]} : vector<4x8xf32> to vector<1x8xf32>
    %68 = vector.broadcast %66 : vector<8x1xf32> to vector<8x8xf32>
    %69 = vector.broadcast %67 : vector<1x8xf32> to vector<8x8xf32>
    %70 = arith.mulf %68, %69 : vector<8x8xf32>
    %71 = arith.addf %65, %70 : vector<8x8xf32>
    %72 = vector.extract_strided_slice %10 {offsets = [0, 1], sizes = [8, 1], strides = [1, 1]} : vector<8x4xf32> to vector<8x1xf32>
    %73 = vector.extract_strided_slice %1 {offsets = [1, 0], sizes = [1, 8], strides = [1, 1]} : vector<4x8xf32> to vector<1x8xf32>
    %74 = vector.broadcast %72 : vector<8x1xf32> to vector<8x8xf32>
    %75 = vector.broadcast %73 : vector<1x8xf32> to vector<8x8xf32>
    %76 = arith.mulf %74, %75 : vector<8x8xf32>
    %77 = arith.addf %53, %76 : vector<8x8xf32>
    %78 = vector.extract_strided_slice %12 {offsets = [0, 1], sizes = [8, 1], strides = [1, 1]} : vector<8x4xf32> to vector<8x1xf32>
    %79 = vector.extract_strided_slice %3 {offsets = [1, 0], sizes = [1, 8], strides = [1, 1]} : vector<4x8xf32> to vector<1x8xf32>
    %80 = vector.broadcast %78 : vector<8x1xf32> to vector<8x8xf32>
    %81 = vector.broadcast %79 : vector<1x8xf32> to vector<8x8xf32>
    %82 = arith.mulf %80, %81 : vector<8x8xf32>
    %83 = arith.addf %77, %82 : vector<8x8xf32>
    %84 = vector.extract_strided_slice %14 {offsets = [0, 1], sizes = [8, 1], strides = [1, 1]} : vector<8x4xf32> to vector<8x1xf32>
    %85 = vector.extract_strided_slice %8 {offsets = [1, 0], sizes = [1, 8], strides = [1, 1]} : vector<4x8xf32> to vector<1x8xf32>
    %86 = vector.broadcast %84 : vector<8x1xf32> to vector<8x8xf32>
    %87 = vector.broadcast %85 : vector<1x8xf32> to vector<8x8xf32>
    %88 = arith.mulf %86, %87 : vector<8x8xf32>
    %89 = arith.addf %83, %88 : vector<8x8xf32>
    %90 = vector.extract_strided_slice %10 {offsets = [0, 2], sizes = [8, 1], strides = [1, 1]} : vector<8x4xf32> to vector<8x1xf32>
    %91 = vector.extract_strided_slice %6 {offsets = [2, 0], sizes = [1, 8], strides = [1, 1]} : vector<4x8xf32> to vector<1x8xf32>
    %92 = vector.broadcast %90 : vector<8x1xf32> to vector<8x8xf32>
    %93 = vector.broadcast %91 : vector<1x8xf32> to vector<8x8xf32>
    %94 = arith.mulf %92, %93 : vector<8x8xf32>
    %95 = arith.addf %71, %94 : vector<8x8xf32>
    %96 = vector.extract_strided_slice %12 {offsets = [0, 2], sizes = [8, 1], strides = [1, 1]} : vector<8x4xf32> to vector<8x1xf32>
    %97 = vector.extract_strided_slice %1 {offsets = [2, 0], sizes = [1, 8], strides = [1, 1]} : vector<4x8xf32> to vector<1x8xf32>
    %98 = vector.broadcast %96 : vector<8x1xf32> to vector<8x8xf32>
    %99 = vector.broadcast %97 : vector<1x8xf32> to vector<8x8xf32>
    %100 = arith.mulf %98, %99 : vector<8x8xf32>
    %101 = arith.addf %95, %100 : vector<8x8xf32>
    %102 = vector.extract_strided_slice %14 {offsets = [0, 2], sizes = [8, 1], strides = [1, 1]} : vector<8x4xf32> to vector<8x1xf32>
    %103 = vector.extract_strided_slice %3 {offsets = [2, 0], sizes = [1, 8], strides = [1, 1]} : vector<4x8xf32> to vector<1x8xf32>
    %104 = vector.broadcast %102 : vector<8x1xf32> to vector<8x8xf32>
    %105 = vector.broadcast %103 : vector<1x8xf32> to vector<8x8xf32>
    %106 = arith.mulf %104, %105 : vector<8x8xf32>
    %107 = arith.addf %101, %106 : vector<8x8xf32>
    %108 = vector.extract_strided_slice %10 {offsets = [0, 2], sizes = [8, 1], strides = [1, 1]} : vector<8x4xf32> to vector<8x1xf32>
    %109 = vector.extract_strided_slice %1 {offsets = [2, 0], sizes = [1, 8], strides = [1, 1]} : vector<4x8xf32> to vector<1x8xf32>
    %110 = vector.broadcast %108 : vector<8x1xf32> to vector<8x8xf32>
    %111 = vector.broadcast %109 : vector<1x8xf32> to vector<8x8xf32>
    %112 = arith.mulf %110, %111 : vector<8x8xf32>
    %113 = arith.addf %89, %112 : vector<8x8xf32>
    %114 = vector.extract_strided_slice %12 {offsets = [0, 2], sizes = [8, 1], strides = [1, 1]} : vector<8x4xf32> to vector<8x1xf32>
    %115 = vector.extract_strided_slice %3 {offsets = [2, 0], sizes = [1, 8], strides = [1, 1]} : vector<4x8xf32> to vector<1x8xf32>
    %116 = vector.broadcast %114 : vector<8x1xf32> to vector<8x8xf32>
    %117 = vector.broadcast %115 : vector<1x8xf32> to vector<8x8xf32>
    %118 = arith.mulf %116, %117 : vector<8x8xf32>
    %119 = arith.addf %113, %118 : vector<8x8xf32>
    %120 = vector.extract_strided_slice %14 {offsets = [0, 2], sizes = [8, 1], strides = [1, 1]} : vector<8x4xf32> to vector<8x1xf32>
    %121 = vector.extract_strided_slice %8 {offsets = [2, 0], sizes = [1, 8], strides = [1, 1]} : vector<4x8xf32> to vector<1x8xf32>
    %122 = vector.broadcast %120 : vector<8x1xf32> to vector<8x8xf32>
    %123 = vector.broadcast %121 : vector<1x8xf32> to vector<8x8xf32>
    %124 = arith.mulf %122, %123 : vector<8x8xf32>
    %125 = arith.addf %119, %124 : vector<8x8xf32>
    %126 = vector.extract_strided_slice %10 {offsets = [0, 3], sizes = [8, 1], strides = [1, 1]} : vector<8x4xf32> to vector<8x1xf32>
    %127 = vector.extract_strided_slice %6 {offsets = [3, 0], sizes = [1, 8], strides = [1, 1]} : vector<4x8xf32> to vector<1x8xf32>
    %128 = vector.broadcast %126 : vector<8x1xf32> to vector<8x8xf32>
    %129 = vector.broadcast %127 : vector<1x8xf32> to vector<8x8xf32>
    %130 = arith.mulf %128, %129 : vector<8x8xf32>
    %131 = arith.addf %107, %130 : vector<8x8xf32>
    %132 = vector.extract_strided_slice %12 {offsets = [0, 3], sizes = [8, 1], strides = [1, 1]} : vector<8x4xf32> to vector<8x1xf32>
    %133 = vector.extract_strided_slice %1 {offsets = [3, 0], sizes = [1, 8], strides = [1, 1]} : vector<4x8xf32> to vector<1x8xf32>
    %134 = vector.broadcast %132 : vector<8x1xf32> to vector<8x8xf32>
    %135 = vector.broadcast %133 : vector<1x8xf32> to vector<8x8xf32>
    %136 = arith.mulf %134, %135 : vector<8x8xf32>
    %137 = arith.addf %131, %136 : vector<8x8xf32>
    %138 = vector.extract_strided_slice %14 {offsets = [0, 3], sizes = [8, 1], strides = [1, 1]} : vector<8x4xf32> to vector<8x1xf32>
    %139 = vector.extract_strided_slice %3 {offsets = [3, 0], sizes = [1, 8], strides = [1, 1]} : vector<4x8xf32> to vector<1x8xf32>
    %140 = vector.broadcast %138 : vector<8x1xf32> to vector<8x8xf32>
    %141 = vector.broadcast %139 : vector<1x8xf32> to vector<8x8xf32>
    %142 = arith.mulf %140, %141 : vector<8x8xf32>
    %143 = arith.addf %137, %142 : vector<8x8xf32>
    %144 = vector.extract_strided_slice %10 {offsets = [0, 3], sizes = [8, 1], strides = [1, 1]} : vector<8x4xf32> to vector<8x1xf32>
    %145 = vector.extract_strided_slice %1 {offsets = [3, 0], sizes = [1, 8], strides = [1, 1]} : vector<4x8xf32> to vector<1x8xf32>
    %146 = vector.broadcast %144 : vector<8x1xf32> to vector<8x8xf32>
    %147 = vector.broadcast %145 : vector<1x8xf32> to vector<8x8xf32>
    %148 = arith.mulf %146, %147 : vector<8x8xf32>
    %149 = arith.addf %125, %148 : vector<8x8xf32>
    %150 = vector.extract_strided_slice %12 {offsets = [0, 3], sizes = [8, 1], strides = [1, 1]} : vector<8x4xf32> to vector<8x1xf32>
    %151 = vector.extract_strided_slice %3 {offsets = [3, 0], sizes = [1, 8], strides = [1, 1]} : vector<4x8xf32> to vector<1x8xf32>
    %152 = vector.broadcast %150 : vector<8x1xf32> to vector<8x8xf32>
    %153 = vector.broadcast %151 : vector<1x8xf32> to vector<8x8xf32>
    %154 = arith.mulf %152, %153 : vector<8x8xf32>
    %155 = arith.addf %149, %154 : vector<8x8xf32>
    %156 = vector.extract_strided_slice %14 {offsets = [0, 3], sizes = [8, 1], strides = [1, 1]} : vector<8x4xf32> to vector<8x1xf32>
    %157 = vector.extract_strided_slice %8 {offsets = [3, 0], sizes = [1, 8], strides = [1, 1]} : vector<4x8xf32> to vector<1x8xf32>
    %158 = vector.broadcast %156 : vector<8x1xf32> to vector<8x8xf32>
    %159 = vector.broadcast %157 : vector<1x8xf32> to vector<8x8xf32>
    %160 = arith.mulf %158, %159 : vector<8x8xf32>
    %161 = arith.addf %155, %160 : vector<8x8xf32>
    %cst_16 = arith.constant 0.000000e+00 : f32
    %162 = vector.broadcast %cst_16 : f32 to vector<8x8xf32>
    %163 = arith.maximumf %143, %162 : vector<8x8xf32>
    %cst_17 = arith.constant 0.000000e+00 : f32
    %164 = vector.broadcast %cst_17 : f32 to vector<8x8xf32>
    %165 = arith.maximumf %161, %164 : vector<8x8xf32>
    %166 = arith.addf %163, %165 : vector<8x8xf32>
    %c0_18 = arith.constant 0 : index
    %c0_19 = arith.constant 0 : index
    %c0_20 = arith.constant 0 : index
    %167 = vector.load %arg4[%c0_18, %c0_19, %c0_20] : memref<1x8x8xf32, #tpu.memory_space<vmem>>, vector<1x8x8xf32>
    %168 = vector.shape_cast %167 : vector<1x8x8xf32> to vector<8x8xf32>
    %169 = vector.shape_cast %166 : vector<8x8xf32> to vector<1x8x8xf32>
    tpu.vector_store %arg4[%c0_18, %c0_19, %c0_20], %169 {strides = array<i32>} : memref<1x8x8xf32, #tpu.memory_space<vmem>>, vector<1x8x8xf32>,
    return
  }
  func.func @transform_0(%arg0: i32) -> (i32, i32, i32, i32) {
    %c0_i32 = arith.constant 0 : i32
    %c0_i32_0 = arith.constant 0 : i32
    %c0_i32_1 = arith.constant 0 : i32
    %c0_i32_2 = arith.constant 0 : i32
    return %arg0, %c0_i32, %c0_i32_0, %c0_i32_1 : i32, i32, i32, i32
  }
  func.func @transform_1(%arg0: i32) -> (i32, i32, i32) {
    %c0_i32 = arith.constant 0 : i32
    %c0_i32_0 = arith.constant 0 : i32
    %c0_i32_1 = arith.constant 0 : i32
    %c0_i32_2 = arith.constant 0 : i32
    return %c0_i32, %c0_i32_0, %c0_i32_1 : i32, i32, i32
  }
  func.func @transform_2(%arg0: i32) -> (i32, i32) {
    %c0_i32 = arith.constant 0 : i32
    %c0_i32_0 = arith.constant 0 : i32
    %c0_i32_1 = arith.constant 0 : i32
    return %c0_i32, %c0_i32_0 : i32, i32
  }
  func.func @transform_3(%arg0: i32) -> (i32, i32, i32) {
    %c0_i32 = arith.constant 0 : i32
    %c0_i32_0 = arith.constant 0 : i32
    %c0_i32_1 = arith.constant 0 : i32
    return %arg0, %c0_i32, %c0_i32_0 : i32, i32, i32
  }
}

</mosaic_0001>

<bundles_post_ra>
// kernel: tpu_custom_call.1
= control target key start
LH: loop header
LB: loop body
LE: loop exit
PB: predicated region body
PF: predicated region fallthrough
CT: control target
= control target key end

     0   :  { %8 = vsyncpa [#allocation3], 0  ;;  %s721_s0 = inlined_call_operand.vmem [shape: f32[2,2,4,8], index: 0, kind: input, shape index: {}]   ;;  %s722_s1 = inlined_call_operand.vmem [shape: f32[3,8,4], index: 1, kind: input, shape index: {}]   ;;  %s723_s2 = inlined_call_operand.vmem [shape: f32[8,1], index: 2, kind: input, shape index: {}]   ;;  %s724_s3 = inlined_call_operand.hbm [shape: f32[2,8,8], index: 3, kind: output, shape index: {}]  }
   0x1   :  { %10 = vsyncpa [#allocation3 + $0x1], 0  ;;  %s595_s12 = smov 0   ;;  %s597_s13 = smov 0  }
   0x2   :  { %s599_s14 = smov 0   ;;  %s601_s15 = smov 0  }
   0x3 LB: > { %s616_s16 = sadd.s32 4294967295, %s566_s15   ;;  %s436_s17 = sadd.s32 4294967294, %s566_s15   ;;  %s566_s15 = sphi %s601_s15, %s730_s15   ;;  %s562_s14 = sphi %s599_s14, %s729_s14   ;;  %s558_s13 = sphi %s597_s13, %s728_s13   ;;  %s554_s12 = sphi %s595_s12, %s727_s12  }
   0x4   : > { %s620_s18 = sadd.s32 1, %s566_s15   ;;  %s91_s19 = sadd.s32 1, %s562_s14 }
   0x5   : > { %s88_s20 = ssub.s32 %s566_s15, %s620_s18  ;;  %p101_p0 = scmp.ne.s32.totalorder %s562_s14, %s558_s13 }
   0x6   : > { %p89_p1 = scmp.eq.s32.totalorder %s88_s20, 0  ;;  %p102_p2 = scmp.eq.s32.totalorder %s616_s16, 1 }
   0x7   : > { %p107_p3 = scmp.ne.s32.totalorder %s558_s13, %s554_s12  ;;  %p108_p4 = scmp.eq.s32.totalorder %s436_s17, 1 }
   0x8   : > { %s631_s21 = scalar_select %p89_p1, %s562_s14, %s91_s19  }
   0x9   : > { %p633_p5 = por %p102_p2, %p101_p0  ;;  %p637_p6 = por %p108_p4, %p107_p3 }
   0xa   : > { %p439_p7 = scmp.ge.s32.totalorder %s566_s15, 1  ;;  %p140_p8 = scmp.lt.s32.totalorder %s566_s15, 3 }
   0xc   : > { %p141_p9 = pnand %p439_p7, %p140_p8 }
   0xd   : > { %v444_v0 = vld [vmem:[%s722_s1 + $0x8] sm:$0xff] (!%p141_p9)  ;;  %v184_v1 = vld [vmem:[%s722_s1] sm:$0xff] (!%p141_p9)  ;;  %p164_p10 = scmp.lt.s32.totalorder (!%p141_p9), %s616_s16, 1  ;;  %v568_v2 = vmov (!%p141_p9), 0   ;;  %v569_v5 = vmov (!%p141_p9), 1   ;;  %s570_s8 = smov (!%p141_p9), 1   ;;  %v200_v10 = vlaneseq (!%p141_p9) }
   0xe   : > { %144 = sbr.rel (%p141_p9) target bundleno = 204 (0xcc), region = 32  ;;  %497 = vset.pattern.permute.xlu1 (!%p141_p9), %v568_v2  ;;  %496 = vset.pattern.permute.xlu0 (!%p141_p9), %v568_v2  ;;  %v189_v3 = vld [vmem:[%s723_s2] sm:$0xff] (!%p141_p9)  ;;  %v445_v6 = vld [vmem:[%s722_s1 + $0x10] sm:$0xff] (!%p141_p9)  ;;  %s571_s11 = smov (!%p141_p9), 127   ;;  %v572_v8 = vmov (!%p141_p9), 2   ;;  %v573_v9 = vmov (!%p141_p9), 3  }
   0xf   : > { %208 = vperm.xlu1 (!%p141_p9), %497, %v444_v0   ;;  %197 = vperm.xlu0 (!%p141_p9), %496, %v184_v1   ;;  %v201_v11 = vshrl.u32 (!%p141_p9), %v200_v10, 7  ;;  %vm176_vm0 = vcmask (!%p141_p9), 7168   ;;  %vm182_vm1 = vcmask (!%p141_p9), 56320   ;;  %s161_s17 = sand.u32 (!%p141_p9), 1, %s558_s13   ;;  %s447_s20 = sshll.u32 (!%p141_p9), %s616_s16, 7  ;;  %vm361_vm2 = vcmask (!%p141_p9), 64512  }
  0x10   : > { %s440_s19 = sshll.u32 (!%p141_p9), %s161_s17, 3  ;;  %s364_s29 = scalar_lea.sflag (!%p141_p9), [#allocation3], %s161_s17 }
  0x11   : > { %v202_v12 = vsub.s32 (!%p141_p9), 0, %v201_v11  ;;  %v244_v27 = vsub.s32 (!%p141_p9), 1, %v201_v11  ;;  %v284_v37 = vsub.s32 (!%p141_p9), 2, %v201_v11  ;;  %s163_s24 = scalar_lea.vmem (!%p141_p9), [#allocation2], %s440_s19 }
  0x12   : > { %s377_s25 = sshll.u32 (!%p141_p9), %s163_s24, 4  ;;  %s681_s25 = int_to_ptr.vmem [resolvable:$true] %s377_s25 }
  0x13   : > { %192 = vperm.xlu0 (!%p141_p9), %496, %v189_v3   ;;  %498 = vset.pattern.permute.xlu1 (!%p141_p9), %v569_v5  ;;  %s504_s30 = scalar_lea.vmem (!%p141_p9), %s681_s25, 128 }
  0x14   : > { %p505_p11 = scmp.ne.s32.totalorder (!%p141_p9), %s681_s25, %s504_s30 }
  0x15   : > { %s165_s28 = scalar_select %p164_p10, %s616_s16, 1 }
  0x16   : > { %p506_p12 = pnand %p505_p11, %p633_p5  ;;  %s574_s16 = smov [#allocation2]  }
  0x17   : > { %s450_s4 = sshll.u32 %s165_s28, 3  ;;  %219 = vperm.xlu0 %496, %v445_v6   ;;  %s679_s28 = scalar_lea.hbm %s724_s3, %s447_s20 }
  0x18   : > { %s168_s7 = scalar_lea.vmem %s721_s0, %s450_s4  ;;  %p507_p13 = pneg %p506_p12 }
  0x19   : > { %v657_v4 = vld [vmem:[%s168_s7 + $0x4] sm:$0xf]  ;;  %v663_v7 = vld [vmem:[%s168_s7] sm:$0xf]  ;;  %s508_s4 = sshll.u32 %s574_s16, 4  ;;  %s509_s4 = int_to_ptr.vmem [resolvable:$false] %s508_s4 }
  0x1a   : > { %173 = vrot.lane.b32.xlu1 %v657_v4, %s570_s8  ;;  %v214_v13 = vrot.slane %v663_v7, %v202_v12  ;;  %v225_v16 = vrot.slane %v657_v4, %v202_v12  ;;  %v255_v40 = vrot.slane %v663_v7, %v244_v27  ;;  %v265_v42 = vrot.slane %v657_v4, %v244_v27  ;;  %s510_s5 = scalar_lea.vmem %s509_s4, 256  ;;  %p511_p0 = scmp.lt.s32.totalorder %s681_s25, %s509_s4 }
  0x1b   : > { %179 = vrot.lane.b32.xlu0 %v663_v7, %s571_s11  ;;  %v295_v58 = vrot.slane %v663_v7, %v284_v37  ;;  %v305_v59 = vrot.slane %v657_v4, %v284_v37  ;;  %p512_p1 = scmp.lt.s32.totalorder %s510_s5, %s504_s30 }
  0x1c   : > { %499 = vset.pattern.permute.xlu0 %v569_v5 }
  0x1d   : > { %p513_p2 = por %p512_p1, %p511_p0 }
  0x1e   : > { %239 = vperm.xlu1 %498, %v184_v1  }
  0x1f   : > { %259 = vperm.xlu0 %499, %v445_v6   ;;  %p514_p3 = pnand %p513_p2, %p507_p13 }
  0x22   : > { %249 = vperm.xlu1 %498, %v444_v0  }
  0x23   : > { %501 = vset.pattern.permute.xlu0 %v572_v8 }
  0x24   : > { %299 = vperm.xlu0 %501, %v445_v6  }
  0x26   : > { %500 = vset.pattern.permute.xlu1 %v572_v8 }
  0x27   : > { %279 = vperm.xlu1 %500, %v184_v1  }
  0x28   : > { %503 = vset.pattern.permute.xlu0 %v573_v9 }
  0x29   : > { %339 = vperm.xlu0 %503, %v445_v6  }
  0x2b   : > { %289 = vperm.xlu1 %500, %v444_v0  }
  0x2f   : > { %502 = vset.pattern.permute.xlu1 %v573_v9 }
  0x30   : > { %319 = vperm.xlu1 %502, %v184_v1   ;;  %v324_v1 = vsub.s32 3, %v201_v11 }
  0x32   : > { %v335_v9 = vrot.slane %v663_v7, %v324_v1 }
  0x34   : > { %329 = vperm.xlu1 %502, %v444_v0  }
  0x8e   : > { %v209_v14 = vpop.permute.xlu1 %208  ;;  %v198_v15 = vpop.permute.xlu0 %197 }
  0x8f   : > { %v228_v17 = vmul.f32 %v214_v13, %v198_v15  ;;  %v230_v20 = vmul.f32 %v225_v16, %v209_v14  ;;  %v215_v29 = vmul.f32 %v214_v13, %v209_v14 }
  0x92   : > { %v193_v18 = vpop.permute.xlu0 %192  ;;  %v174_v19 = vpop.permute.xlu1 %173 }
  0x93   : > { %v229_v21 = vadd.f32 %v228_v17, %v193_v18  ;;  %v177_v22 = vsel %vm176_vm0, 0.0, %v174_v19  ;;  %v345_v19 = vrot.slane %v657_v4, %v324_v1 }
  0x94   : > { %v203_v23 = vrot.slane %v177_v22, %v202_v12  ;;  %v245_v33 = vrot.slane %v177_v22, %v244_v27  ;;  %v285_v48 = vrot.slane %v177_v22, %v284_v37  ;;  %v325_v14 = vrot.slane %v177_v22, %v324_v1 }
  0x95   : > { %v231_v24 = vadd.f32 %v230_v20, %v229_v21 }
  0x96   : > { %v204_v25 = vmul.f32 %v203_v23, %v198_v15  ;;  %v220_v26 = vpop.permute.xlu0 %219 }
  0x97   : > { %v226_v32 = vmul.f32 %v225_v16, %v220_v26 }
  0x98   : > { %v205_v30 = vadd.f32 %v204_v25, %v193_v18 }
  0x9a   : > { %v216_v31 = vadd.f32 %v215_v29, %v205_v30  ;;  %v180_v34 = vpop.permute.xlu0 %179 }
  0x9b   : > { %v183_v35 = vsel %vm182_vm1, %v180_v34, 0.0 }
  0x9c   : > { %v227_v38 = vadd.f32 %v226_v32, %v216_v31  ;;  %v235_v41 = vrot.slane %v183_v35, %v202_v12  ;;  %v275_v52 = vrot.slane %v183_v35, %v244_v27  ;;  %v315_v12 = vrot.slane %v183_v35, %v284_v37 }
  0x9d   : > { %v240_v28 = vpop.permute.xlu1 %239 }
  0x9e   : > { %v246_v39 = vmul.f32 %v245_v33, %v240_v28  ;;  %v236_v44 = vmul.f32 %v235_v41, %v220_v26  ;;  %v260_v46 = vpop.permute.xlu0 %259  ;;  %v268_v49 = vmul.f32 %v255_v40, %v240_v28 }
  0x9f   : > { %v266_v47 = vmul.f32 %v265_v42, %v260_v46  ;;  %v276_v61 = vmul.f32 %v275_v52, %v260_v46 }
  0xa0   : > { %v247_v43 = vadd.f32 %v246_v39, %v227_v38  ;;  %v237_v50 = vadd.f32 %v236_v44, %v231_v24  ;;  %v355_v24 = vrot.slane %v183_v35, %v324_v1 }
  0xa1   : > { %v250_v36 = vpop.permute.xlu1 %249 }
  0xa2   : > { %v256_v45 = vmul.f32 %v255_v40, %v250_v36  ;;  %v269_v55 = vadd.f32 %v268_v49, %v237_v50  ;;  %v270_v56 = vmul.f32 %v265_v42, %v250_v36 }
  0xa3   : > { %v300_v63 = vpop.permute.xlu0 %299 }
  0xa4   : > { %v257_v51 = vadd.f32 %v256_v45, %v247_v43  ;;  %v271_v60 = vadd.f32 %v270_v56, %v269_v55  ;;  %v306_v2 = vmul.f32 %v305_v59, %v300_v63  ;;  %v316_v17 = vmul.f32 %v315_v12, %v300_v63 }
  0xa6   : > { %v280_v53 = vpop.permute.xlu1 %279  ;;  %v267_v57 = vadd.f32 %v266_v47, %v257_v51  ;;  %v277_v5 = vadd.f32 %v276_v61, %v271_v60 }
  0xa7   : > { %v286_v54 = vmul.f32 %v285_v48, %v280_v53  ;;  %v308_v6 = vmul.f32 %v295_v58, %v280_v53 }
  0xa8   : > { %v340_v11 = vpop.permute.xlu0 %339 }
  0xa9   : > { %v287_v62 = vadd.f32 %v286_v54, %v267_v57  ;;  %v309_v10 = vadd.f32 %v308_v6, %v277_v5  ;;  %v346_v25 = vmul.f32 %v345_v19, %v340_v11  ;;  %v356_v29 = vmul.f32 %v355_v24, %v340_v11 }
  0xaa   : > { %v290_v0 = vpop.permute.xlu1 %289 }
  0xab   : > { %v296_v3 = vmul.f32 %v295_v58, %v290_v0  ;;  %v310_v13 = vmul.f32 %v305_v59, %v290_v0 }
  0xad   : > { %v297_v8 = vadd.f32 %v296_v3, %v287_v62  ;;  %v311_v18 = vadd.f32 %v310_v13, %v309_v10 }
  0xaf   : > { %v320_v15 = vpop.permute.xlu1 %319  ;;  %v307_v16 = vadd.f32 %v306_v2, %v297_v8  ;;  %v317_v21 = vadd.f32 %v316_v17, %v311_v18 }
  0xb0   : > { %v326_v20 = vmul.f32 %v325_v14, %v320_v15  ;;  %v348_v23 = vmul.f32 %v335_v9, %v320_v15 }
  0xb2   : > { %v327_v7 = vadd.f32 %v326_v20, %v307_v16  ;;  %v349_v27 = vadd.f32 %v348_v23, %v317_v21 }
  0xb3   : > { %v330_v26 = vpop.permute.xlu1 %329 }
  0xb4   : > { %v336_v28 = vmul.f32 %v335_v9, %v330_v26  ;;  %v350_v22 = vmul.f32 %v345_v19, %v330_v26 }
  0xb6   : > { %v337_v30 = vadd.f32 %v336_v28, %v327_v7  ;;  %v351_v31 = vadd.f32 %v350_v22, %v349_v27 }
  0xb8   : > { %v347_v32 = vadd.f32 %v346_v25, %v337_v30  ;;  %v357_v4 = vadd.f32 %v356_v29, %v351_v31 }
  0xba   : > { %v358_v33 = vmax.f32 %v347_v32, 0.0  ;;  %v359_v34 = vmax.f32 %v357_v4, 0.0 }
  0xbc   : > { %v360_v35 = vadd.f32 %v359_v34, %v358_v33 }
  0xbe   : > { %362 = vst.msk [vmem:[%s163_s24] sm:$0xff] %vm361_vm2, %v360_v35 }
  0xbf   : > { %517 = shalt.err (!%p514_p3)
}
  0xc0   : > { %s518_s6 = scalar_lea.hbm %s679_s28, 128  ;;  %s522_s9 = scalar_lea.hbm %s724_s3, 256 }
  0xc1   : > { %p519_p4 = scmp.ne.s32.totalorder %s679_s28, %s518_s6  ;;  %p523_p9 = scmp.lt.u32.totalorder %s679_s28, %s724_s3 }
  0xc2   : > { %p524_p10 = scmp.lt.u32.totalorder %s522_s9, %s518_s6  ;;  %p526_p12 = scmp.lt.u32.totalorder %s518_s6, %s679_s28 }
  0xc3   : > { %p520_p7 = pnand %p519_p4, %p633_p5 }
  0xc4   : > { %p525_p11 = por %p524_p10, %p523_p9 }
  0xc5   : > { %p521_p8 = pneg %p520_p7 }
  0xc6   : > { %p527_p13 = por %p526_p12, %p525_p11 }
  0xc8   : > { %p528_p0 = pnand %p527_p13, %p521_p8 }
  0xca   : > { %531 = shalt.err (!%p528_p0)
}
  0xcb   : > { %451 = dma.vmem_to_hbm [thread:$0]  (%p633_p5), %s681_s25, 128, %s679_s28, %s364_s29  }
  0xcc PF: > { %p457_p1 = scmp.ge.s32.totalorder %s566_s15, 2  ;;  %s389_s17 = sand.u32 1, %s554_s12  }
  0xcd   : > { %s390_s19 = scalar_lea.sflag [#allocation3], %s389_s17 }
  0xce   : > { %p454_p2 = pnand %p457_p1, %p637_p6 }
  0xd0   : > { %549 = dma.done.wait (!%p454_p2), %s390_s19, 128  }
  0xd1   : > { %551 = vsyncadd (!%p454_p2), %s390_s19, 4294967168  ;;  %p13_p3 = scmp.ge.s32.totalorder %s620_s18, 4   ;;  %s727_s12 = smov %s558_s13 }
  0xd2   : > { %s728_s13 = smov %s562_s14  ;;  %s729_s14 = smov %s631_s21 }
  0xd3   : > { %s730_s15 = smov %s620_s18  ;;  %15 = sbr.rel (!%p13_p3) target bundleno = 3 (0x3), region = 70 }
  0xda   :  { %395 = vsyncpa [#allocation3], 1 }
  0xdb   :  { %397 = vsyncpa [#allocation3 + $0x1], 1 }

</bundles_post_ra>
